<compile_context>
chip_gen: v5e
topology: v5e:2x2
jax: 0.10.0
libtpu: 0.0.40
codegen_flags: <defaults>
</compile_context>

<pallas_src>
import functools
import math

import jax
import jax.numpy as jnp
from jax.experimental import pallas as pl
from jax.experimental.pallas import tpu as pltpu


def _layernorm_kernel(x_ref, w_ref, b_ref, o_ref, *, eps, inv_c):
    # x_ref: (TR, C) row tile; w_ref/b_ref: (1, C); o_ref: (TR, C)
    x = x_ref[...].astype(jnp.float32)
    mean = jnp.sum(x, axis=-1, keepdims=True) * inv_c
    d = x - mean
    var = jnp.sum(d * d, axis=-1, keepdims=True) * inv_c   # biased variance (LayerNorm)
    inv_std = jax.lax.rsqrt(var + eps)
    w = w_ref[...].astype(jnp.float32)
    b = b_ref[...].astype(jnp.float32)
    o_ref[...] = (d * inv_std * w + b).astype(o_ref.dtype)


def _round_up(n, m):
    return ((n + m - 1) // m) * m


def _pick_row_tile(rows, channels, itemsize):
    # in + out blocks, double-buffered => ~4 live buffers of (TR, C).
    budget = 8 * 1024 * 1024  # conservative: fits default scoped VMEM on all generations
    max_tr = max(8, budget // max(1, 4 * channels * itemsize))
    max_tr = max(8, (max_tr // 8) * 8)
    return max(8, min(max_tr, 1024, _round_up(rows, 8)))


def layer_norm(x, weight, bias, *, eps=1e-6, data_format="channels_last"):
    """Pallas LayerNorm matching the PyTorch module's forward."""
    if data_format == "channels_first":
        # Move the channel axis last, normalize, move it back.
        x_cl = jnp.moveaxis(x, 1, -1)
        y = layer_norm(x_cl, weight, bias, eps=eps, data_format="channels_last")
        return jnp.moveaxis(y, -1, 1)
    if data_format != "channels_last":
        raise NotImplementedError(data_format)

    orig_shape = x.shape
    C = orig_shape[-1]
    R = int(math.prod(orig_shape[:-1]))
    x2 = x.reshape(R, C)

    TR = _pick_row_tile(R, C, jnp.dtype(x.dtype).itemsize)
    R_pad = pl.cdiv(R, TR) * TR
    if R_pad != R:
        # Rows are independent; zero-padded rows produce finite garbage that is sliced off.
        x2 = jnp.pad(x2, ((0, R_pad - R), (0, 0)))

    w2 = weight.reshape(1, C)
    b2 = bias.reshape(1, C)

    out = pl.pallas_call(
        functools.partial(_layernorm_kernel, eps=float(eps), inv_c=1.0 / float(C)),
        out_shape=jax.ShapeDtypeStruct((R_pad, C), x.dtype),
        grid=(R_pad // TR,),
        in_specs=[
            pl.BlockSpec((TR, C), lambda i: (i, 0)),
            pl.BlockSpec((1, C), lambda i: (0, 0)),
            pl.BlockSpec((1, C), lambda i: (0, 0)),
        ],
        out_specs=pl.BlockSpec((TR, C), lambda i: (i, 0)),
        compiler_params=pltpu.CompilerParams(
            dimension_semantics=("parallel",),
            vmem_limit_bytes=32 * 1024 * 1024,
        ),
    )(x2, w2, b2)

    if R_pad != R:
        out = out[:R]
    return out.reshape(orig_shape)


# ---------------- pure-JAX references (match the PyTorch forward) ----------------

def _reference_channels_last(x, w, b, eps):
    xf = x.astype(jnp.float32)
    mean = jnp.mean(xf, axis=-1, keepdims=True)
    var = jnp.mean((xf - mean) ** 2, axis=-1, keepdims=True)
    y = (xf - mean) / jnp.sqrt(var + eps)
    return (y * w + b).astype(x.dtype)


def _reference_channels_first(x, w, b, eps):
    xf = x.astype(jnp.float32)
    u = jnp.mean(xf, axis=1, keepdims=True)
    s = jnp.mean((xf - u) ** 2, axis=1, keepdims=True)
    y = (xf - u) / jnp.sqrt(s + eps)
    shape = (1, -1) + (1,) * (x.ndim - 2)
    return (w.reshape(shape) * y + b.reshape(shape)).astype(x.dtype)


if __name__ == "__main__":
    key = jax.random.PRNGKey(0)
    k1, k2, k3, k4 = jax.random.split(key, 4)

    C = 32
    eps = 1e-6
    w = 1.0 + 0.1 * jax.random.normal(k2, (C,), dtype=jnp.float32)
    b = 0.1 * jax.random.normal(k3, (C,), dtype=jnp.float32)

    # channels_last: (B, T, C)
    B, T = 2, 16
    x_cl = jax.random.normal(k1, (B, T, C), dtype=jnp.float32)
    y_cl = jax.block_until_ready(
        layer_norm(x_cl, w, b, eps=eps, data_format="channels_last"))
    ref_cl = _reference_channels_last(x_cl, w, b, eps)
    assert y_cl.shape == x_cl.shape, y_cl.shape
    assert jnp.allclose(y_cl, ref_cl, atol=1e-4, rtol=1e-4), "channels_last mismatch"

    # channels_first: (B, C, F, T) as used inside redimnet
    Bf, Ff, Tf = 2, 4, 16
    x_cf = jax.random.normal(k4, (Bf, C, Ff, Tf), dtype=jnp.float32)
    y_cf = jax.block_until_ready(
        layer_norm(x_cf, w, b, eps=eps, data_format="channels_first"))
    ref_cf = _reference_channels_first(x_cf, w, b, eps)
    assert y_cf.shape == x_cf.shape, y_cf.shape
    assert jnp.allclose(y_cf, ref_cf, atol=1e-4, rtol=1e-4), "channels_first mismatch"

    print("KERNEL_OK")
</pallas_src>

<mosaic_0001>
module attributes {stable_mosaic.version = 11 : i64} {
  func.func @_layernorm_kernel(%arg0: i32, %arg1: memref<32x32xf32, #tpu.memory_space<vmem>>, %arg2: memref<1x32xf32, #tpu.memory_space<vmem>>, %arg3: memref<1x32xf32, #tpu.memory_space<vmem>>, %arg4: memref<32x32xf32, #tpu.memory_space<vmem>>) attributes {dimension_semantics = [#tpu.dimension_semantics<parallel>], iteration_bounds = array<i64: 1>, scalar_prefetch = 0 : i64, scratch_operands = 0 : i64, tpu.core_type = #tpu.core_type<tc>, window_params = [{transform_indices = @transform_0, window_bounds = array<i64: 32, 32>}, {pipeline_mode = #tpu.pipeline_mode<synchronous>, transform_indices = @transform_1, window_bounds = array<i64: 1, 32>}, {pipeline_mode = #tpu.pipeline_mode<synchronous>, transform_indices = @transform_2, window_bounds = array<i64: 1, 32>}, {transform_indices = @transform_3, window_bounds = array<i64: 32, 32>}]} {
    %c0 = arith.constant 0 : index
    %c0_0 = arith.constant 0 : index
    %0 = vector.load %arg1[%c0, %c0_0] : memref<32x32xf32, #tpu.memory_space<vmem>>, vector<32x32xf32>
    %cst = arith.constant dense<0.000000e+00> : vector<32xf32>
    %1 = vector.multi_reduction <add>, %0, %cst [1] : vector<32x32xf32> to vector<32xf32>
    %2 = vector.shape_cast %1 : vector<32xf32> to vector<32x1xf32>
    %cst_1 = arith.constant 3.125000e-02 : f32
    %3 = vector.broadcast %cst_1 : f32 to vector<32x1xf32>
    %4 = arith.mulf %2, %3 : vector<32x1xf32>
    %5 = vector.broadcast %4 : vector<32x1xf32> to vector<32x32xf32>
    %6 = arith.subf %0, %5 : vector<32x32xf32>
    %7 = arith.mulf %6, %6 : vector<32x32xf32>
    %cst_2 = arith.constant dense<0.000000e+00> : vector<32xf32>
    %8 = vector.multi_reduction <add>, %7, %cst_2 [1] : vector<32x32xf32> to vector<32xf32>
    %9 = vector.shape_cast %8 : vector<32xf32> to vector<32x1xf32>
    %cst_3 = arith.constant 3.125000e-02 : f32
    %10 = vector.broadcast %cst_3 : f32 to vector<32x1xf32>
    %11 = arith.mulf %9, %10 : vector<32x1xf32>
    %cst_4 = arith.constant 9.99999997E-7 : f32
    %12 = vector.broadcast %cst_4 : f32 to vector<32x1xf32>
    %13 = arith.addf %11, %12 : vector<32x1xf32>
    %14 = math.rsqrt %13 : vector<32x1xf32>
    %c0_5 = arith.constant 0 : index
    %c0_6 = arith.constant 0 : index
    %15 = vector.load %arg2[%c0_5, %c0_6] : memref<1x32xf32, #tpu.memory_space<vmem>>, vector<1x32xf32>
    %c0_7 = arith.constant 0 : index
    %c0_8 = arith.constant 0 : index
    %16 = vector.load %arg3[%c0_7, %c0_8] : memref<1x32xf32, #tpu.memory_space<vmem>>, vector<1x32xf32>
    %17 = vector.broadcast %14 : vector<32x1xf32> to vector<32x32xf32>
    %18 = arith.mulf %6, %17 : vector<32x32xf32>
    %19 = vector.broadcast %15 : vector<1x32xf32> to vector<32x32xf32>
    %20 = arith.mulf %18, %19 : vector<32x32xf32>
    %21 = vector.broadcast %16 : vector<1x32xf32> to vector<32x32xf32>
    %22 = arith.addf %20, %21 : vector<32x32xf32>
    %c0_9 = arith.constant 0 : index
    %c0_10 = arith.constant 0 : index
    %23 = vector.load %arg4[%c0_9, %c0_10] : memref<32x32xf32, #tpu.memory_space<vmem>>, vector<32x32xf32>
    tpu.vector_store %arg4[%c0_9, %c0_10], %22 {strides = array<i32>} : memref<32x32xf32, #tpu.memory_space<vmem>>, vector<32x32xf32>,
    return
  }
  func.func @transform_0(%arg0: i32) -> (i32, i32) {
    %c0_i32 = arith.constant 0 : i32
    %c0_i32_0 = arith.constant 0 : i32
    return %arg0, %c0_i32 : i32, i32
  }
  func.func @transform_1(%arg0: i32) -> (i32, i32) {
    %c0_i32 = arith.constant 0 : i32
    %c0_i32_0 = arith.constant 0 : i32
    %c0_i32_1 = arith.constant 0 : i32
    return %c0_i32, %c0_i32_0 : i32, i32
  }
  func.func @transform_2(%arg0: i32) -> (i32, i32) {
    %c0_i32 = arith.constant 0 : i32
    %c0_i32_0 = arith.constant 0 : i32
    %c0_i32_1 = arith.constant 0 : i32
    return %c0_i32, %c0_i32_0 : i32, i32
  }
  func.func @transform_3(%arg0: i32) -> (i32, i32) {
    %c0_i32 = arith.constant 0 : i32
    %c0_i32_0 = arith.constant 0 : i32
    return %arg0, %c0_i32 : i32, i32
  }
}

</mosaic_0001>

<bundles_post_ra>
// kernel: tpu_custom_call.1
= control target key start
LH: loop header
LB: loop body
LE: loop exit
PB: predicated region body
PF: predicated region fallthrough
CT: control target
= control target key end

     0   :  { %8 = vsyncpa [#allocation3], 0  ;;  %s341_s0 = inlined_call_operand.hbm [shape: f32[32,32], index: 0, kind: input, shape index: {}]   ;;  %s342_s1 = inlined_call_operand.hbm [shape: f32[1,32], index: 1, kind: input, shape index: {}]   ;;  %s343_s2 = inlined_call_operand.vmem [shape: f32[1,32], index: 2, kind: input, shape index: {}]   ;;  %s344_s3 = inlined_call_operand.hbm [shape: f32[32,32], index: 3, kind: output, shape index: {}]  }
   0x1   :  { %9 = vsyncpa [#allocation6], 0 }
   0x2   :  { %10 = vsyncpa [#allocation4], 0  ;;  %s15_s14 = sshll.u32 %s341_s0, 4  ;;  %s271_s15 = smov [#allocation2]   ;;  %s16_s14 = int_to_ptr.hbm [resolvable:$true] %s15_s14 }
   0x3   :  { %s17_s16 = sshll.u32 %s271_s15, 4  ;;  %s29_s19 = sshll.u32 %s342_s1, 4  ;;  %s18_s16 = int_to_ptr.vmem [resolvable:$true] %s17_s16  ;;  %s30_s19 = int_to_ptr.hbm [resolvable:$true] %s29_s19 }
   0x4   :  { %s272_s20 = smov 128   ;;  %s273_s21 = smov 8  }
   0x5   :  { %23 = dma.hbm_to_vmem [thread:$0]  %s16_s14, 512, %s18_s16, [#allocation3], %s272_s20, %s272_s20, %s273_s21  }
   0x6   :  { %s274_s22 = smov [#allocation5]  }
   0x7   :  { %s31_s23 = sshll.u32 %s274_s22, 4  ;;  %s32_s23 = int_to_ptr.vmem [resolvable:$true] %s31_s23 }
   0x8   :  { %34 = dma.hbm_to_vmem [thread:$0]  %s30_s19, 16, %s32_s23, [#allocation6]  }
   0x9   :  { %265 = dma.done.wait [#allocation3], 512  }
   0xa   :  { %266 = vsyncadd [#allocation3], 4294966784 }
   0xb   :  { %267 = dma.done.wait [#allocation6], 16  }
   0xc   :  { %268 = vsyncadd [#allocation6], 4294967280  ;;  %vm49_vm0 = vcmask 261120   ;;  %v47_v0 = vld [vmem:[#allocation2 + $0x10] sm:$0xff]  ;;  %v45_v1 = vld [vmem:[#allocation2] sm:$0xff]  ;;  %s164_s27 = sshll.u32 %s344_s3, 4  ;;  %s165_s27 = int_to_ptr.hbm [resolvable:$true] %s164_s27 }
   0xd   :  { %v56_v2 = vsel %vm49_vm0, %v47_v0, 0.0  ;;  %v50_v3 = vsel %vm49_vm0, %v45_v1, 0.0  ;;  %v48_v4 = vld [vmem:[#allocation2 + $0x18] sm:$0xff]  ;;  %v46_v5 = vld [vmem:[#allocation2 + $0x8] sm:$0xff]  ;;  %v183_v54 = vld [vmem:[#allocation5] ss:$0 sm:$0xff] }
   0xe   :  { %57 = vadd.xlane.f32.xlu1 %v56_v2  ;;  %51 = vadd.xlane.f32.xlu0 %v50_v3  ;;  %v59_v6 = vsel %vm49_vm0, %v48_v4, 0.0  ;;  %v53_v7 = vsel %vm49_vm0, %v46_v5, 0.0  ;;  %v184_v59 = vld [vmem:[%s343_s2] ss:$0 sm:$0xff]  ;;  %s275_s2 = smov [#allocation7]  }
   0xf   :  { %s162_s24 = sshll.u32 %s275_s2, 4  ;;  %s163_s24 = int_to_ptr.vmem [resolvable:$true] %s162_s24 }
  0x16   :  { %60 = vadd.xlane.f32.xlu1 %v59_v6  ;;  %54 = vadd.xlane.f32.xlu0 %v53_v7 }
  0x81   :  { %v58_v8 = vpop.xlane.xlu1 %57  ;;  %v52_v9 = vpop.xlane.xlu0 %51 }
  0x82   :  { %v64_v10 = vmul.f32 0.03125, %v58_v8  ;;  %v62_v11 = vmul.f32 0.03125, %v52_v9 }
  0x84   :  { %v309_v12 = vsub.f32 %v47_v0, %v64_v10  ;;  %v66_v13 = vsub.f32 %v45_v1, %v62_v11 }
  0x86   :  { %v72_v14 = vmul.f32 %v309_v12, %v309_v12  ;;  %v70_v15 = vmul.f32 %v66_v13, %v66_v13 }
  0x88   :  { %v80_v16 = vsel %vm49_vm0, %v72_v14, 0.0  ;;  %v74_v17 = vsel %vm49_vm0, %v70_v15, 0.0 }
  0x89   :  { %v61_v18 = vpop.xlane.xlu1 %60  ;;  %81 = vadd.xlane.f32.xlu0 %v80_v16  ;;  %75 = vadd.xlane.f32.xlu2 %v74_v17  ;;  %v55_v19 = vpop.xlane.xlu0 %54 }
  0x8a   :  { %v65_v20 = vmul.f32 0.03125, %v61_v18  ;;  %v63_v21 = vmul.f32 0.03125, %v55_v19 }
  0x8c   :  { %v315_v22 = vsub.f32 %v48_v4, %v65_v20  ;;  %v317_v23 = vsub.f32 %v46_v5, %v63_v21 }
  0x8e   :  { %v73_v24 = vmul.f32 %v315_v22, %v315_v22  ;;  %v71_v25 = vmul.f32 %v317_v23, %v317_v23 }
  0x90   :  { %v83_v26 = vsel %vm49_vm0, %v73_v24, 0.0  ;;  %v77_v27 = vsel %vm49_vm0, %v71_v25, 0.0 }
  0x91   :  { %84 = vadd.xlane.f32.xlu1 %v83_v26  ;;  %78 = vadd.xlane.f32.xlu2 %v77_v27 }
  0xfc   :  { %v76_v28 = vpop.xlane.xlu2 %75  ;;  %v82_v29 = vpop.xlane.xlu0 %81 }
  0xfd   :  { %v86_v30 = vmul.f32 0.03125, %v76_v28  ;;  %v88_v31 = vmul.f32 0.03125, %v82_v29 }
  0xff   :  { %v90_v32 = vadd.f32 1e-06, %v86_v30  ;;  %v92_v33 = vadd.f32 1e-06, %v88_v31 }
 0x101   :  { %185 = vrsqrt.f32 %v90_v32  ;;  %vm100_vm3 = vweird.f32 %v90_v32  ;;  %vm120_vm5 = vweird.f32 %v92_v33 }
 0x102   :  { %187 = vrsqrt.f32 %v92_v33 }
 0x104   :  { %v85_v34 = vpop.xlane.xlu1 %84  ;;  %v79_v35 = vpop.xlane.xlu2 %78 }
 0x105   :  { %v89_v36 = vmul.f32 0.03125, %v85_v34  ;;  %v87_v37 = vmul.f32 0.03125, %v79_v35 }
 0x107   :  { %v186_v38 = vpop.eup %185  ;;  %v93_v39 = vadd.f32 1e-06, %v89_v36  ;;  %v91_v40 = vadd.f32 1e-06, %v87_v37 }
 0x108   :  { %v188_v41 = vpop.eup %187  ;;  %v95_v42 = vmul.f32 %v186_v38, %v90_v32  ;;  %vm101_vm1 = vweird.f32 %v186_v38 }
 0x109   :  { %v115_v43 = vmul.f32 %v188_v41, %v92_v33  ;;  %189 = vrsqrt.f32 %v93_v39  ;;  %vm121_vm2 = vweird.f32 %v188_v41  ;;  %vm102_vm4 = vmor %vm100_vm3, %vm101_vm1  ;;  %vm130_vm9 = vweird.f32 %v93_v39 }
 0x10a   :  { %v96_v44 = vmul.f32 %v186_v38, %v95_v42  ;;  %191 = vrsqrt.f32 %v91_v40  ;;  %vm122_vm6 = vmor %vm120_vm5, %vm121_vm2  ;;  %vm110_vm11 = vweird.f32 %v91_v40 }
 0x10b   :  { %v116_v45 = vmul.f32 %v188_v41, %v115_v43 }
 0x10c   :  { %v97_v46 = vmul.f32 0.5, %v96_v44 }
 0x10d   :  { %v117_v47 = vmul.f32 0.5, %v116_v45 }
 0x10e   :  { %v98_v48 = vsub.f32 1.5, %v97_v46 }
 0x10f   :  { %v190_v49 = vpop.eup %189  ;;  %v118_v50 = vsub.f32 1.5, %v117_v47 }
 0x110   :  { %v192_v51 = vpop.eup %191  ;;  %v99_v52 = vmul.f32 %v186_v38, %v98_v48  ;;  %v125_v53 = vmul.f32 %v190_v49, %v93_v39  ;;  %vm131_vm7 = vweird.f32 %v190_v49 }
 0x111   :  { %v119_v55 = vmul.f32 %v188_v41, %v118_v50  ;;  %v105_v56 = vmul.f32 %v192_v51, %v91_v40  ;;  %vm111_vm8 = vweird.f32 %v192_v51  ;;  %vm132_vm10 = vmor %vm130_vm9, %vm131_vm7 }
 0x112   :  { %v103_v57 = vsel %vm102_vm4, %v186_v38, %v99_v52  ;;  %v126_v58 = vmul.f32 %v190_v49, %v125_v53  ;;  %vm112_vm12 = vmor %vm110_vm11, %vm111_vm8 }
 0x113   :  { %v136_v60 = vmul.f32 %v103_v57, %v66_v13  ;;  %v123_v61 = vsel %vm122_vm6, %v188_v41, %v119_v55  ;;  %v106_v62 = vmul.f32 %v192_v51, %v105_v56 }
 0x114   :  { %v138_v63 = vmul.f32 %v123_v61, %v309_v12  ;;  %v127_v0 = vmul.f32 0.5, %v126_v58 }
 0x115   :  { %v143_v1 = vmul.f32 %v183_v54, %v136_v60  ;;  %v107_v2 = vmul.f32 0.5, %v106_v62 }
 0x116   :  { %v145_v3 = vmul.f32 %v183_v54, %v138_v63  ;;  %v128_v4 = vsub.f32 1.5, %v127_v0 }
 0x117   :  { %v150_v5 = vadd.f32 %v184_v59, %v143_v1  ;;  %v108_v6 = vsub.f32 1.5, %v107_v2 }
 0x118   :  { %v152_v7 = vadd.f32 %v184_v59, %v145_v3  ;;  %v129_v8 = vmul.f32 %v190_v49, %v128_v4 }
 0x119   :  { %154 = vst.msk [vmem:[#allocation7] sm:$0xff] %vm49_vm0, %v150_v5  ;;  %v109_v9 = vmul.f32 %v192_v51, %v108_v6 }
 0x11a   :  { %156 = vst.msk [vmem:[#allocation7 + $0x10] sm:$0xff] %vm49_vm0, %v152_v7  ;;  %v133_v10 = vsel %vm132_vm10, %v190_v49, %v129_v8 }
 0x11b   :  { %v139_v11 = vmul.f32 %v133_v10, %v315_v22  ;;  %v113_v12 = vsel %vm112_vm12, %v192_v51, %v109_v9 }
 0x11c   :  { %v137_v13 = vmul.f32 %v113_v12, %v317_v23 }
 0x11d   :  { %v146_v14 = vmul.f32 %v183_v54, %v139_v11 }
 0x11e   :  { %v144_v15 = vmul.f32 %v183_v54, %v137_v13 }
 0x11f   :  { %v153_v16 = vadd.f32 %v184_v59, %v146_v14 }
 0x120   :  { %v151_v17 = vadd.f32 %v184_v59, %v144_v15 }
 0x121   :  { %157 = vst.msk [vmem:[#allocation7 + $0x18] sm:$0xff] %vm49_vm0, %v153_v16 }
 0x122   :  { %155 = vst.msk [vmem:[#allocation7 + $0x8] sm:$0xff] %vm49_vm0, %v151_v17 }
 0x123   :  { %170 = dma.vmem_to_hbm [thread:$0]  %s163_s24, 512, %s165_s27, [#allocation4], %s272_s20, %s272_s20, %s273_s21  }
 0x124   :  { %269 = dma.done.wait [#allocation4], 512  }
 0x125   :  { %270 = vsyncadd [#allocation4], 4294966784 }
 0x126   :  { %175 = vsyncpa [#allocation3], 1 }
 0x127   :  { %176 = vsyncpa [#allocation6], 1 }
 0x128   :  { %177 = vsyncpa [#allocation4], 1 }

</bundles_post_ra>
